<compile_context>
chip_gen: v7x
topology: tpu7x:2x2x1
jax: 0.10.0
libtpu: 0.0.40
codegen_flags: <defaults>
</compile_context>

<pallas_src>
import math
import jax
import jax.numpy as jnp
from jax.experimental import pallas as pl
from jax.experimental.pallas import tpu as pltpu


def _softplus(x):
    # PyTorch nn.Softplus default (beta=1, threshold=20)
    return jnp.where(x > 20.0, x, jnp.log1p(jnp.exp(jnp.minimum(x, 20.0))))


def _y_p_from_sums(sums):
    """sums: (2, M) with row0 = sum(exp), row1 = sum(y*exp) -> y_p (1, M)."""
    denom = sums[0:1, :]
    num = sums[1:2, :]
    r = pl.reciprocal(denom, approx=True)      # EUP slot
    r = r * (2.0 - denom * r)                  # one Newton step -> ~f32 accuracy
    return num * r


def _finish_heads(y_p, wh, bh, K, out_ref):
    """Fused mu/sigma heads: one (1, M) x (M, 2K) matmul + one store."""
    head = jnp.dot(y_p, wh, preferred_element_type=jnp.float32) + bh   # (1, 2K)
    col = jax.lax.broadcasted_iota(jnp.int32, head.shape, 1)
    out_ref[...] = jnp.where(col < K, head, _softplus(head))


def _make_single_block_kernel(K: int):
    """grid == 1 fast path: whole problem resident, no online softmax, no scratch,
    no masking (blocks equal the full array dims, so no padding is ever read)."""

    def kernel(e_ref, aug_ref, wp_ref, bp_ref, wh_ref, bh_ref, out_ref):
        logits = (jnp.dot(e_ref[...], wp_ref[...], preferred_element_type=jnp.float32)
                  + bp_ref[...])                                        # (Ns, M)
        m = jnp.max(logits, axis=0, keepdims=True)                      # (1, M)
        p = jnp.exp(logits - m)                                         # (Ns, M)
        # Both column sums on the (otherwise idle) MXU: [sum(exp) ; sum(y*exp)].
        sums = jnp.dot(aug_ref[...], p, preferred_element_type=jnp.float32)  # (2, M)
        _finish_heads(_y_p_from_sums(sums), wh_ref[...], bh_ref[...], K, out_ref)

    return kernel


def _make_streaming_kernel(K: int, tn: int, has_tail: bool):
    """grid > 1: online softmax over streamed (tn, D) blocks of e."""

    def kernel(ns_ref, e_ref, aug_ref, wp_ref, bp_ref, wh_ref, bh_ref,
               out_ref, m_acc, s_acc):
        i = pl.program_id(0)

        @pl.when(i == 0)
        def _():
            m_acc[...] = jnp.full_like(m_acc, -1e30)
            s_acc[...] = jnp.zeros_like(s_acc)

        logits = (jnp.dot(e_ref[...], wp_ref[...], preferred_element_type=jnp.float32)
                  + bp_ref[...])                                        # (tn, M)
        aug = aug_ref[...]                                              # (2, tn)

        if has_tail:
            # Only compiled in when Ns % tn != 0: the tail of the final block is
            # unspecified VMEM, so mask logit rows (for max/exp) AND aug columns
            # (so garbage y can never meet a nonzero p term).
            limit = ns_ref[0] - i * tn
            row = jax.lax.broadcasted_iota(jnp.int32, logits.shape, 0)
            logits = jnp.where(row < limit, logits, -1e30)
            col = jax.lax.broadcasted_iota(jnp.int32, aug.shape, 1)
            aug = jnp.where(col < limit, aug, 0.0)

        blk_max = jnp.max(logits, axis=0, keepdims=True)                # (1, M)
        m_new = jnp.maximum(m_acc[...], blk_max)
        alpha = jnp.exp(m_acc[...] - m_new)                             # (1, M)
        p = jnp.exp(logits - m_new)           # masked rows underflow to exactly 0
        # [sum(exp) ; sum(y*exp)] for this block as one MXU matmul.
        sums = jnp.dot(aug, p, preferred_element_type=jnp.float32)      # (2, M)
        s_acc[...] = alpha * s_acc[...] + sums
        m_acc[...] = m_new

        @pl.when(i == pl.num_programs(0) - 1)
        def _():
            _finish_heads(_y_p_from_sums(s_acc[...]), wh_ref[...], bh_ref[...],
                          K, out_ref)

    return kernel


def prepare_params(params, *, stream_dtype=jnp.bfloat16):
    """One-time conversion of PyTorch-layout params to kernel layout.

    Hoists transposes / concatenation / casts out of the per-call path. The
    e-side of the portfolio matmul streams in `stream_dtype` (bf16 default);
    everything after the softmax stays f32.
    """
    Wp, bp = params["Wp"], params["bp"]          # (M, D), (M,)
    Wmu, bmu = params["Wmu"], params["bmu"]      # (K, M), (K,)
    Wsig, bsig = params["Wsig"], params["bsig"]  # (K, M), (K,)
    M = Wp.shape[0]
    K = Wmu.shape[0]
    return {
        "Wp_t": jnp.asarray(Wp, jnp.float32).T.astype(stream_dtype),        # (D, M)
        "bp": jnp.asarray(bp, jnp.float32).reshape(1, M),                   # (1, M)
        "W_head": jnp.concatenate([jnp.asarray(Wmu, jnp.float32).T,
                                   jnp.asarray(Wsig, jnp.float32).T], axis=1),  # (M, 2K)
        "b_head": jnp.concatenate([jnp.asarray(bmu, jnp.float32),
                                   jnp.asarray(bsig, jnp.float32)]).reshape(1, 2 * K),
        "M": M,
        "K": K,
        "stream_dtype": stream_dtype,
    }


def factor_encoder_forward(e, y, prepped, *, block_rows=8192):
    """e: (Ns, D), y: (Ns,). Returns (mu: (K,), sigma: (K,))."""
    Ns, D = e.shape
    M, K = prepped["M"], prepped["K"]

    # Callers can pass e already in stream_dtype (e.g. bf16) to make this a no-op.
    e = e.astype(prepped["stream_dtype"])
    # Lane-dense [ones ; y] so both column sums ride the MXU inside the kernel.
    aug = jnp.concatenate(
        [jnp.ones((1, Ns), jnp.float32), y.astype(jnp.float32).reshape(1, Ns)],
        axis=0)                                                          # (2, Ns)

    common = dict(
        out_shape=jax.ShapeDtypeStruct((1, 2 * K), jnp.float32),
        compiler_params=pltpu.CompilerParams(
            dimension_semantics=("arbitrary",),      # Ns is a reduction axis
            vmem_limit_bytes=32 * 1024 * 1024,       # sized for v7x (64 MiB phys)
        ),
    )

    if Ns <= block_rows:
        # Fast path: grid == 1, blocks equal full array dims -> no pad, no mask,
        # no scratch, no online softmax.
        out = pl.pallas_call(
            _make_single_block_kernel(K),
            grid_spec=pltpu.PrefetchScalarGridSpec(
                num_scalar_prefetch=0,
                grid=(1,),
                in_specs=[
                    pl.BlockSpec((Ns, D), lambda i: (0, 0)),        # e (resident)
                    pl.BlockSpec((2, Ns), lambda i: (0, 0)),        # [ones ; y]
                    pl.BlockSpec((D, M), lambda i: (0, 0)),         # Wp^T
                    pl.BlockSpec((1, M), lambda i: (0, 0)),         # bp
                    pl.BlockSpec((M, 2 * K), lambda i: (0, 0)),     # [Wmu^T | Wsig^T]
                    pl.BlockSpec((1, 2 * K), lambda i: (0, 0)),     # [bmu | bsig]
                ],
                out_specs=pl.BlockSpec((1, 2 * K), lambda i: (0, 0)),
            ),
            **common,
        )(e, aug, prepped["Wp_t"], prepped["bp"], prepped["W_head"], prepped["b_head"])
    else:
        # Streaming path: blocks of tn stocks (tn multiple of 128 so the aug lane
        # dim is legal), no wrapper-side pad; Ns arrives via scalar prefetch.
        tn = max(128, (block_rows // 128) * 128)
        grid = pl.cdiv(Ns, tn)
        has_tail = (Ns % tn) != 0
        ns_arr = jnp.array([Ns], jnp.int32)

        out = pl.pallas_call(
            _make_streaming_kernel(K, tn, has_tail),
            grid_spec=pltpu.PrefetchScalarGridSpec(
                num_scalar_prefetch=1,
                grid=(grid,),
                in_specs=[
                    pl.BlockSpec((tn, D), lambda i, ns: (i, 0)),      # e: streamed
                    pl.BlockSpec((2, tn), lambda i, ns: (0, i)),      # [ones ; y]
                    pl.BlockSpec((D, M), lambda i, ns: (0, 0)),       # Wp^T (resident)
                    pl.BlockSpec((1, M), lambda i, ns: (0, 0)),       # bp
                    pl.BlockSpec((M, 2 * K), lambda i, ns: (0, 0)),   # [Wmu^T | Wsig^T]
                    pl.BlockSpec((1, 2 * K), lambda i, ns: (0, 0)),   # [bmu | bsig]
                ],
                out_specs=pl.BlockSpec((1, 2 * K), lambda i, ns: (0, 0)),
                scratch_shapes=[
                    pltpu.VMEM((1, M), jnp.float32),   # running max
                    pltpu.VMEM((2, M), jnp.float32),   # running [sum(exp) ; sum(y*exp)]
                ],
            ),
            **common,
        )(ns_arr, e, aug, prepped["Wp_t"], prepped["bp"],
          prepped["W_head"], prepped["b_head"])

    return out[0, :K], out[0, K:]


def init_params(key, embedding_dim, M, K):
    """PyTorch-Linear-style uniform init: U(-1/sqrt(fan_in), 1/sqrt(fan_in))."""
    ks = jax.random.split(key, 6)

    def lin(kw, kb, out_f, in_f):
        bound = 1.0 / math.sqrt(in_f)
        W = jax.random.uniform(kw, (out_f, in_f), jnp.float32, -bound, bound)
        b = jax.random.uniform(kb, (out_f,), jnp.float32, -bound, bound)
        return W, b

    Wp, bp = lin(ks[0], ks[1], M, embedding_dim)
    Wmu, bmu = lin(ks[2], ks[3], K, M)
    Wsig, bsig = lin(ks[4], ks[5], K, M)
    return dict(Wp=Wp, bp=bp, Wmu=Wmu, bmu=bmu, Wsig=Wsig, bsig=bsig)


def reference_forward(e, y, p):
    # pure-JAX f32 reference for correctness
    logits = e @ p["Wp"].T + p["bp"]
    a_p = jax.nn.softmax(logits, axis=0)
    y_p = jnp.einsum('n,nm->m', y, a_p)
    mu = y_p @ p["Wmu"].T + p["bmu"]
    sigma = jax.nn.softplus(y_p @ p["Wsig"].T + p["bsig"])
    return mu, sigma


if __name__ == "__main__":
    embedding_dim, M, K = 32, 16, 4

    key = jax.random.PRNGKey(0)
    k_p, k_data = jax.random.split(key)
    params = init_params(k_p, embedding_dim, M, K)

    # (Ns, block_rows): fast path (grid=1, incl. a non-8-aligned Ns with no pad),
    # and the streaming path with a masked partial tail (300 = 2*128 + 44).
    cases = [(13, 8192), (200, 8192), (300, 128)]

    for stream_dtype, tol in ((jnp.float32, 2e-3), (jnp.bfloat16, 3e-2)):
        prepped = prepare_params(params, stream_dtype=stream_dtype)
        for idx, (Ns, block_rows) in enumerate(cases):
            k_e, k_y = jax.random.split(jax.random.fold_in(k_data, idx))
            e = jax.random.normal(k_e, (Ns, embedding_dim), jnp.float32)
            y = jax.random.normal(k_y, (Ns,), jnp.float32)

            mu, sigma = factor_encoder_forward(e, y, prepped, block_rows=block_rows)
            jax.block_until_ready((mu, sigma))

            mu_ref, sigma_ref = reference_forward(e, y, params)
            assert mu.shape == (K,) and sigma.shape == (K,)
            assert jnp.allclose(mu, mu_ref, atol=tol, rtol=tol), (stream_dtype, Ns, mu, mu_ref)
            assert jnp.allclose(sigma, sigma_ref, atol=tol, rtol=tol), (stream_dtype, Ns, sigma, sigma_ref)

    print("KERNEL_OK")
</pallas_src>

<mosaic_0001>
module attributes {stable_mosaic.version = 11 : i64} {
  func.func @kernel(%arg0: i32, %arg1: memref<13x32xf32, #tpu.memory_space<vmem>>, %arg2: memref<2x13xf32, #tpu.memory_space<vmem>>, %arg3: memref<32x16xf32, #tpu.memory_space<vmem>>, %arg4: memref<1x16xf32, #tpu.memory_space<vmem>>, %arg5: memref<16x8xf32, #tpu.memory_space<vmem>>, %arg6: memref<1x8xf32, #tpu.memory_space<vmem>>, %arg7: memref<1x8xf32, #tpu.memory_space<vmem>>) attributes {dimension_semantics = [#tpu.dimension_semantics<arbitrary>], iteration_bounds = array<i64: 1>, scalar_prefetch = 0 : i64, scratch_operands = 0 : i64, tpu.core_type = #tpu.core_type<tc>, window_params = [{pipeline_mode = #tpu.pipeline_mode<synchronous>, transform_indices = @transform_0, window_bounds = array<i64: 13, 32>}, {pipeline_mode = #tpu.pipeline_mode<synchronous>, transform_indices = @transform_1, window_bounds = array<i64: 2, 13>}, {pipeline_mode = #tpu.pipeline_mode<synchronous>, transform_indices = @transform_2, window_bounds = array<i64: 32, 16>}, {pipeline_mode = #tpu.pipeline_mode<synchronous>, transform_indices = @transform_3, window_bounds = array<i64: 1, 16>}, {pipeline_mode = #tpu.pipeline_mode<synchronous>, transform_indices = @transform_4, window_bounds = array<i64: 16, 8>}, {pipeline_mode = #tpu.pipeline_mode<synchronous>, transform_indices = @transform_5, window_bounds = array<i64: 1, 8>}, {pipeline_mode = #tpu.pipeline_mode<synchronous>, transform_indices = @transform_6, window_bounds = array<i64: 1, 8>}]} {
    %c0 = arith.constant 0 : index
    %c0_0 = arith.constant 0 : index
    %0 = vector.load %arg1[%c0, %c0_0] : memref<13x32xf32, #tpu.memory_space<vmem>>, vector<13x32xf32>
    %c0_1 = arith.constant 0 : index
    %c0_2 = arith.constant 0 : index
    %1 = vector.load %arg3[%c0_1, %c0_2] : memref<32x16xf32, #tpu.memory_space<vmem>>, vector<32x16xf32>
    %cst = arith.constant dense<0.000000e+00> : vector<13x16xf32>
    %2 = tpu.matmul %0, %1, %cst {dimension_numbers = #tpu.dot_dimension_numbers<[1], [0], [0], [1], [0, 0, 1, 1], [], []>} : vector<13x32xf32>, vector<32x16xf32>, vector<13x16xf32> -> vector<13x16xf32>
    %c0_3 = arith.constant 0 : index
    %c0_4 = arith.constant 0 : index
    %3 = vector.load %arg4[%c0_3, %c0_4] : memref<1x16xf32, #tpu.memory_space<vmem>>, vector<1x16xf32>
    %4 = vector.broadcast %3 : vector<1x16xf32> to vector<13x16xf32>
    %5 = arith.addf %2, %4 : vector<13x16xf32>
    %cst_5 = arith.constant dense<0xFF800000> : vector<16xf32>
    %6 = vector.multi_reduction <maximumf>, %5, %cst_5 [0] : vector<13x16xf32> to vector<16xf32>
    %7 = vector.shape_cast %6 : vector<16xf32> to vector<1x16xf32>
    %8 = vector.broadcast %7 : vector<1x16xf32> to vector<13x16xf32>
    %9 = arith.subf %5, %8 : vector<13x16xf32>
    %10 = math.exp %9 : vector<13x16xf32>
    %c0_6 = arith.constant 0 : index
    %c0_7 = arith.constant 0 : index
    %11 = vector.load %arg2[%c0_6, %c0_7] : memref<2x13xf32, #tpu.memory_space<vmem>>, vector<2x13xf32>
    %cst_8 = arith.constant dense<0.000000e+00> : vector<2x16xf32>
    %12 = tpu.matmul %11, %10, %cst_8 {dimension_numbers = #tpu.dot_dimension_numbers<[1], [0], [0], [1], [0, 0, 1, 1], [], []>} : vector<2x13xf32>, vector<13x16xf32>, vector<2x16xf32> -> vector<2x16xf32>
    %13 = vector.extract_strided_slice %12 {offsets = [0, 0], sizes = [1, 16], strides = [1, 1]} : vector<2x16xf32> to vector<1x16xf32>
    %14 = vector.extract_strided_slice %12 {offsets = [1, 0], sizes = [1, 16], strides = [1, 1]} : vector<2x16xf32> to vector<1x16xf32>
    %15 = tpu.reciprocal %13 {approx = true} : vector<1x16xf32> -> vector<1x16xf32>
    %16 = arith.mulf %13, %15 : vector<1x16xf32>
    %cst_9 = arith.constant 2.000000e+00 : f32
    %17 = vector.broadcast %cst_9 : f32 to vector<1x16xf32>
    %18 = arith.subf %17, %16 : vector<1x16xf32>
    %19 = arith.mulf %15, %18 : vector<1x16xf32>
    %20 = arith.mulf %14, %19 : vector<1x16xf32>
    %c0_10 = arith.constant 0 : index
    %c0_11 = arith.constant 0 : index
    %21 = vector.load %arg5[%c0_10, %c0_11] : memref<16x8xf32, #tpu.memory_space<vmem>>, vector<16x8xf32>
    %c0_12 = arith.constant 0 : index
    %c0_13 = arith.constant 0 : index
    %22 = vector.load %arg6[%c0_12, %c0_13] : memref<1x8xf32, #tpu.memory_space<vmem>>, vector<1x8xf32>
    %cst_14 = arith.constant dense<0.000000e+00> : vector<1x8xf32>
    %23 = tpu.matmul %20, %21, %cst_14 {dimension_numbers = #tpu.dot_dimension_numbers<[1], [0], [0], [1], [0, 0, 1, 1], [], []>} : vector<1x16xf32>, vector<16x8xf32>, vector<1x8xf32> -> vector<1x8xf32>
    %24 = arith.addf %23, %22 : vector<1x8xf32>
    %25 = tpu.iota {dimensions = array<i32: 1>} : vector<1x8xi32>
    %c4_i32 = arith.constant 4 : i32
    %26 = vector.broadcast %c4_i32 : i32 to vector<1x8xi32>
    %27 = arith.cmpi slt, %25, %26 : vector<1x8xi32>
    %cst_15 = arith.constant 2.000000e+01 : f32
    %28 = vector.broadcast %cst_15 : f32 to vector<1x8xf32>
    %29 = arith.cmpf ogt, %24, %28 : vector<1x8xf32>
    %cst_16 = arith.constant 2.000000e+01 : f32
    %30 = vector.broadcast %cst_16 : f32 to vector<1x8xf32>
    %31 = arith.minimumf %24, %30 : vector<1x8xf32>
    %32 = math.exp %31 : vector<1x8xf32>
    %33 = math.log1p %32 : vector<1x8xf32>
    %34 = arith.select %29, %24, %33 : vector<1x8xi1>, vector<1x8xf32>
    %35 = arith.select %27, %24, %34 : vector<1x8xi1>, vector<1x8xf32>
    %c0_17 = arith.constant 0 : index
    %c0_18 = arith.constant 0 : index
    %36 = vector.load %arg7[%c0_17, %c0_18] : memref<1x8xf32, #tpu.memory_space<vmem>>, vector<1x8xf32>
    tpu.vector_store %arg7[%c0_17, %c0_18], %35 {strides = array<i32>} : memref<1x8xf32, #tpu.memory_space<vmem>>, vector<1x8xf32>,
    return
  }
  func.func @transform_0(%arg0: i32) -> (i32, i32) {
    %c0_i32 = arith.constant 0 : i32
    %c0_i32_0 = arith.constant 0 : i32
    %c0_i32_1 = arith.constant 0 : i32
    return %c0_i32, %c0_i32_0 : i32, i32
  }
  func.func @transform_1(%arg0: i32) -> (i32, i32) {
    %c0_i32 = arith.constant 0 : i32
    %c0_i32_0 = arith.constant 0 : i32
    %c0_i32_1 = arith.constant 0 : i32
    return %c0_i32, %c0_i32_0 : i32, i32
  }
  func.func @transform_2(%arg0: i32) -> (i32, i32) {
    %c0_i32 = arith.constant 0 : i32
    %c0_i32_0 = arith.constant 0 : i32
    %c0_i32_1 = arith.constant 0 : i32
    return %c0_i32, %c0_i32_0 : i32, i32
  }
  func.func @transform_3(%arg0: i32) -> (i32, i32) {
    %c0_i32 = arith.constant 0 : i32
    %c0_i32_0 = arith.constant 0 : i32
    %c0_i32_1 = arith.constant 0 : i32
    return %c0_i32, %c0_i32_0 : i32, i32
  }
  func.func @transform_4(%arg0: i32) -> (i32, i32) {
    %c0_i32 = arith.constant 0 : i32
    %c0_i32_0 = arith.constant 0 : i32
    %c0_i32_1 = arith.constant 0 : i32
    return %c0_i32, %c0_i32_0 : i32, i32
  }
  func.func @transform_5(%arg0: i32) -> (i32, i32) {
    %c0_i32 = arith.constant 0 : i32
    %c0_i32_0 = arith.constant 0 : i32
    %c0_i32_1 = arith.constant 0 : i32
    return %c0_i32, %c0_i32_0 : i32, i32
  }
  func.func @transform_6(%arg0: i32) -> (i32, i32) {
    %c0_i32 = arith.constant 0 : i32
    %c0_i32_0 = arith.constant 0 : i32
    %c0_i32_1 = arith.constant 0 : i32
    return %c0_i32, %c0_i32_0 : i32, i32
  }
}

</mosaic_0001>

<bundles_post_ra>
// kernel: tpu_custom_call.1
= control target key start
LH: loop header
LB: loop body
LE: loop exit
PB: predicated region body
PF: predicated region fallthrough
CT: control target
= control target key end

     0   :  { %vm37_vm0 = vcmask 261120   ;;  %s520_s0 = inlined_call_operand.vmem [shape: f32[13,32], index: 0, kind: input, shape index: {}]   ;;  %s521_s1 = inlined_call_operand.vmem [shape: f32[2,13], index: 1, kind: input, shape index: {}]   ;;  %s522_s2 = inlined_call_operand.vmem [shape: f32[32,16], index: 2, kind: input, shape index: {}]   ;;  %s523_s3 = inlined_call_operand.vmem [shape: f32[1,16], index: 3, kind: input, shape index: {}]   ;;  %s524_s4 = inlined_call_operand.vmem [shape: f32[16,8], index: 4, kind: input, shape index: {}]   ;;  %s525_s5 = inlined_call_operand.vmem [shape: f32[1,8], index: 5, kind: input, shape index: {}]   ;;  %s526_s6 = inlined_call_operand.hbm [shape: f32[1,8], index: 6, kind: output, shape index: {}]  }
   0x1   :  { %v26_v0 = vld [vmem:[%s522_s2] sm:$0xff]  ;;  %v27_v1 = vld [vmem:[%s522_s2 + $0x8] sm:$0xff]  ;;  %v28_v2 = vld [vmem:[%s522_s2 + $0x10] sm:$0xff] }
   0x2   :  { %v377_v3 = vpack.c.bf16 %v27_v1, %v26_v0  ;;  %v29_v4 = vld [vmem:[%s522_s2 + $0x18] sm:$0xff]  ;;  %v24_v5 = vld [vmem:[%s520_s0] sm:$0xff] }
   0x3   :  { %v381_v6 = vpack.c.bf16 %v29_v4, %v28_v2  ;;  %360 = vmatprep.mubr.msk.f32.mxu0 %vm37_vm0, %v24_v5 }
   0x4   :  { %11 = vsyncpa [#allocation3], 0  ;;  %378 = vmatprep.subr.bf16.mxu0 %v377_v3  ;;  %v25_v7 = vld [vmem:[%s520_s0 + $0x8] sm:$0x1f]  ;;  %v431_v8 = vmov 0.0|0.0   ;;  %vm432_vm1 = vmmov 0   ;;  %v300_v53 = vlaneseq }
   0x5   :  { %380 = vmatpush3.bf16.msra.mxu0 %v377_v3  ;;  %385 = vmatprep.subr.bf16.mxu1 %v431_v8  ;;  %v433_v9 = vmov 0.0   ;;  %v334_v10 = vld [vmem:[%s523_s3] ss:$0 sm:$0xff]  ;;  %vm121_vm2 = vcmask 126976   ;;  %vm119_vm3 = vcmask 130048   ;;  %vm141_vm4 = vcmask 1044480  }
   0x6   :  { %382 = vmatprep.subr.bf16.mxu0 %v381_v6  ;;  %367 = vmatprep.mubr.msk.f32.mxu1 %vm432_vm1, %v433_v9  ;;  %vm434_vm5 = vmmov 1   ;;  %v136_v31 = vld [vmem:[%s521_s1] sm:$0x3]  ;;  %vm137_vm7 = vcmask 105472   ;;  %v224_v33 = vld [vmem:[%s524_s4 + $0x8] sm:$0xff]  ;;  %v301_v55 = vand.u32 127, %v300_v53 }
   0x7   :  { %vm387_vm6 = vmpackc.low %vm141_vm4, %vm434_vm5  ;;  %v223_v32 = vld [vmem:[%s524_s4] sm:$0xff]  ;;  %s435_s4 = smov [#allocation2]   ;;  %vm318_vm11 = vcmask 57344  }
   0x8   :  { %v390_v34 = vpack.c.bf16 %v224_v33, %v223_v32  ;;  %v225_v44 = vld [vmem:[%s525_s5] sm:$0x1]  ;;  %s326_s15 = sshll.u32 %s435_s4, 4  ;;  %vm302_vm8 = vcmp.lt.s32.totalorder %v301_v55, 4  ;;  %s327_s15 = int_to_ptr.vmem [resolvable:$true] %s326_s15 }
   0x9   :  { %384 = vmatpush3.bf16.msra.mxu0 %v381_v6  ;;  %s407_s5 = scalar_lea.vmem %s327_s15, 16  ;;  %s411_s16 = scalar_lea.vmem %s327_s15, 32 }
   0xa   :  { %p408_p0 = scmp.ne.s32.totalorder %s327_s15, %s407_s5  ;;  %p412_p1 = scmp.lt.s32.totalorder %s327_s15, %s327_s15 }
   0xb   :  { %p413_p2 = scmp.lt.s32.totalorder %s411_s16, %s407_s5 }
   0xc   :  { %361 = vmatmul.mubr.msk.f32.vlgmr.msra.gmra.mrb[0].mxu0 %vm37_vm0, %v25_v7 }
   0xd   :  { %p414_p3 = por %p413_p2, %p412_p1 }
   0xf   :  { %p415_p4 = pnand %p414_p3, %p408_p0 }
  0xdf   :  { %v362_v11 = vpop.f32.mrb[0].mxu0 }
  0xe0   :  { %v116_v12 = vadd.f32 %v362_v11, %v334_v10  ;;  %v110_v13 = vpop.f32.mrb[1].mxu0 }
  0xe1   :  { %v111_v14 = vadd.f32 %v334_v10, %v110_v13 }
  0xe2   :  { %v122_v15 = vsel %vm121_vm2, %v116_v12, -inf }
  0xe3   :  { %v120_v16 = vsel %vm119_vm3, %v111_v14, -inf }
  0xe4   :  { %v123_v17 = vmax.f32 %v120_v16, %v122_v15 }
  0xe6   :  { %v124_v18 = vrot.slane %v123_v17, 4 }
  0xe8   :  { %v125_v19 = vmax.f32 %v123_v17, %v124_v18 }
  0xea   :  { %v126_v20 = vrot.slane %v125_v19, 2 }
  0xec   :  { %v127_v21 = vmax.f32 %v125_v19, %v126_v20 }
  0xee   :  { %v128_v22 = vrot.slane %v127_v21, 1 }
  0xf0   :  { %v129_v23 = vmax.f32 %v127_v21, %v128_v22 }
  0xf2   :  { %v130_v24 = vsub.f32 %v111_v14, %v129_v23  ;;  %v131_v25 = vsub.f32 %v116_v12, %v129_v23 }
  0xf4   :  { %v132_v26 = vmul.f32 1.442695, %v130_v24  ;;  %v134_v27 = vmul.f32 1.442695, %v131_v25 }
  0xf6   :  { %397 = vpow2.f32 %v132_v26 }
  0xf7   :  { %399 = vpow2.f32 %v134_v27 }
 0x100   :  { %v398_v28 = vpop.eup %397 }
 0x101   :  { %v400_v29 = vpop.eup %399 }
 0x102   :  { %v386_v30 = vpack.c.bf16 %v400_v29, %v398_v28 }
 0x104   :  { %388 = vmatpush3.bf16.msk.msra.mxu1 %vm387_vm6, %v386_v30 }
 0x105   :  { %389 = vmatprep.subr.bf16.mxu1 %v431_v8 }
 0x107   :  { %368 = vmatmul.mubr.msk.f32.vlgmr.msra.gmra.mrb[0].mxu1 %vm137_vm7, %v136_v31 }
 0x108   :  { %374 = vmatprep.mubr.msk.f32.mxu1 %vm432_vm1, %v433_v9  ;;  %391 = vmatpush3.bf16.msra.mxu1 %v390_v34 }
 0x1da   :  { %v211_v35 = vpop.f32.mrb[0].mxu1 }
 0x1db   :  { %401 = vrcp.f32 %v211_v35  ;;  %v369_v36 = vpop.f32.mrb[1].mxu1 }
 0x1e5   :  { %v402_v37 = vpop.eup %401 }
 0x1e6   :  { %v216_v38 = vmul.f32 %v402_v37, %v211_v35 }
 0x1e8   :  { %v217_v39 = vsub.f32 2.0, %v216_v38 }
 0x1ea   :  { %v218_v40 = vmul.f32 %v402_v37, %v217_v39 }
 0x1ec   :  { %v220_v41 = vrot.slane %v218_v40, 7 }
 0x1ee   :  { %v222_v42 = vmul.f32 %v220_v41, %v211_v35 }
 0x1f0   :  { %v227_v43 = vrot.slane %v222_v42, 1 }
 0x1f2   :  { %375 = vmatmul.mubr.msk.f32.vlgmr.msra.gmra.mrb[2].mxu1 %vm119_vm3, %v227_v43 }
 0x2c5   :  { %v296_v45 = vpop.f32.mrb[2].mxu1 }
 0x2c6   :  { %v297_v46 = vadd.f32 %v296_v45, %v225_v44  ;;  %v376_v47 = vpop.f32.mrb[3].mxu1 }
 0x2c8   :  { %v304_v48 = vmin.f32 %v297_v46, 20.0  ;;  %vm303_vm10 = vcmp.gt.f32.partialorder %v297_v46, 20.0 }
 0x2ca   :  { %v305_v49 = vmul.f32 1.442695, %v304_v48 }
 0x2cc   :  { %403 = vpow2.f32 %v305_v49 }
 0x2d6   :  { %v404_v50 = vpop.eup %403 }
 0x2d7   :  { %v307_v51 = vadd.f32 1.0, %v404_v50  ;;  %v310_v52 = vmul.f32 -0.5, %v404_v50  ;;  %v313_v56 = vand.u32 2147483647, %v404_v50 }
 0x2d9   :  { %405 = vlog2.f32 %v307_v51  ;;  %v311_v54 = vadd.f32 1.0, %v310_v52  ;;  %vm314_vm9 = vcmp.lt.f32.partialorder %v313_v56, 0.0004427343 }
 0x2db   :  { %v312_v59 = vmul.f32 %v404_v50, %v311_v54 }
 0x2e3   :  { %v406_v57 = vpop.eup %405 }
 0x2e4   :  { %v309_v58 = vmul.f32 0.6931472, %v406_v57 }
 0x2e6   :  { %v315_v60 = vsel %vm314_vm9, %v312_v59, %v309_v58 }
 0x2e7   :  { %v316_v61 = vsel %vm303_vm10, %v297_v46, %v315_v60 }
 0x2e8   :  { %v317_v62 = vsel %vm302_vm8, %v297_v46, %v316_v61 }
 0x2e9   :  { %319 = vst.msk [vmem:[#allocation2] sm:$0x1] %vm318_vm11, %v317_v62 }
 0x2ea   :  { %418 = shalt.err (!%p415_p4)
}
 0x2eb   :  { %s419_s19 = scalar_lea.hbm %s526_s6, 16 }
 0x2ec   :  { %p420_p5 = scmp.ne.s32.totalorder %s526_s6, %s419_s19  ;;  %p423_p6 = scmp.lt.u32.totalorder %s419_s19, %s526_s6 }
 0x2ee   :  { %p425_p7 = pnand %p423_p6, %p420_p5 }
 0x2f0   :  { %428 = shalt.err (!%p425_p7)
}
 0x2f1   :  { %329 = dma.vmem_to_hbm [thread:$0]  %s327_s15, 16, %s526_s6, [#allocation3]  }
 0x2f2   :  { %429 = dma.done.wait [#allocation3], 16  }
 0x2f3   :  { %430 = vsyncadd [#allocation3], 4294967280 }
 0x2f4   :  { %333 = vsyncpa [#allocation3], 1 }

</bundles_post_ra>
